<compile_context>
chip_gen: v7x
topology: tpu7x:2x2x1
jax: 0.10.0
libtpu: 0.0.40
codegen_flags: <defaults>
</compile_context>

<pallas_src>
import functools

import jax
import jax.numpy as jnp
from jax.experimental import pallas as pl
from jax.experimental.pallas import tpu as pltpu


def _round_up(a: int, b: int) -> int:
    return (a + b - 1) // b * b


def _mlp_kernel(x_ref, w1_ref, b1_ref, w2_ref, b2_ref, o_ref):
    """One (TILE_N, in_size) batch tile -> (TILE_N, out_size) output tile."""
    # In-kernel bf16 cast of x (x is DMA'd in its stored f32 layout).
    x = x_ref[...].astype(jnp.bfloat16)
    w1 = w1_ref[...].astype(jnp.bfloat16)   # no-op when weights stored bf16
    # fc1: (TILE_N, in) @ (in, h) -> f32 accumulate on the MXU.
    h = jnp.dot(x, w1, preferred_element_type=jnp.float32)
    h = jnp.maximum(h + b1_ref[...], 0.0)                     # bias + ReLU in f32
    # fc2: bf16 operands, f32 accumulate; narrow out dim stays unpadded.
    w2 = w2_ref[...].astype(jnp.bfloat16)
    y = jnp.dot(h.astype(jnp.bfloat16), w2, preferred_element_type=jnp.float32)
    o_ref[...] = (y + b2_ref[...]).astype(o_ref.dtype)


@functools.partial(jax.jit, static_argnames=("tile_n",))
def neuralnet_forward(x, w1, b1, w2, b2, *, tile_n=512):
    """Fused MLP forward.

    x : (N, in_size) f32
    w1: (in_size, h)         (bf16 preferred; any float dtype accepted)
    b1: (1, h) f32
    w2: (h, out_size)        (bf16 preferred)
    b2: (1, out_size) f32
    returns (N, out_size) f32
    """
    N, in_size = x.shape
    h = w1.shape[1]
    out_size = w2.shape[1]

    # ---- batch tiling (no padding: ragged last block handled by Pallas) ----
    TILE_N = min(tile_n, _round_up(N, 8))
    # v7x megacore: for large N make sure the batch grid has >= 2 steps so the
    # "parallel" axis actually shards across both TensorCores.
    if N >= 1024:
        TILE_N = min(TILE_N, _round_up(-(-N // 2), 8))
    grid = (pl.cdiv(N, TILE_N),)

    # ---- VMEM budget: 2x double-buffered x/out tiles + resident weights ----
    x_item = x.dtype.itemsize
    vmem_need = (
        2 * TILE_N * in_size * x_item          # x tile (double-buffered)
        + 2 * TILE_N * out_size * 4            # out tile (double-buffered)
        + 2 * (in_size * h * w1.dtype.itemsize # resident weights/biases
               + h * 4
               + h * out_size * w2.dtype.itemsize
               + out_size * 4)
    )
    # 48 MiB cap is safe on v7x (64 MiB physical); 32 MiB floor = default scope.
    vmem_limit = int(min(max(2 * vmem_need, 32 << 20), 48 << 20))

    # Advisory cost: bytes in the dtypes actually DMA'd, unpadded shapes.
    cost = pl.CostEstimate(
        flops=2 * N * (in_size * h + h * out_size),
        transcendentals=0,
        bytes_accessed=(N * in_size * x_item
                        + in_size * h * w1.dtype.itemsize + h * 4
                        + h * out_size * w2.dtype.itemsize + out_size * 4
                        + N * out_size * 4),
    )

    return pl.pallas_call(
        _mlp_kernel,
        out_shape=jax.ShapeDtypeStruct((N, out_size), jnp.float32),
        grid=grid,
        in_specs=[
            # batch-streamed activation tile (double-buffered by Pallas);
            # last dim == full array dim, so no 128-lane padding needed.
            pl.BlockSpec((TILE_N, in_size), lambda i: (i, 0)),
            # weights / biases: constant index_map -> VMEM-resident across grid
            # (single-buffering them via pipeline_mode is a further VMEM saving
            #  only relevant when in_size/h scale up).
            pl.BlockSpec((in_size, h), lambda i: (0, 0)),
            pl.BlockSpec((1, h), lambda i: (0, 0)),
            pl.BlockSpec((h, out_size), lambda i: (0, 0)),
            pl.BlockSpec((1, out_size), lambda i: (0, 0)),
        ],
        # unpadded narrow output block: masked stores are fine, kernel is
        # DMA-bound, and this cuts writeback bytes ~32x vs a 128-lane pad.
        out_specs=pl.BlockSpec((TILE_N, out_size), lambda i: (i, 0)),
        compiler_params=pltpu.CompilerParams(
            dimension_semantics=("parallel",),   # batch axis: megacore-shardable
            vmem_limit_bytes=vmem_limit,
        ),
        cost_estimate=cost,
    )(x, w1, b1, w2, b2)


def init_params(key, in_size, h, out_size):
    """Deterministic init mirroring nn.Linear default (uniform +-1/sqrt(fan_in)),
    weights stored transposed as (fan_in, fan_out), f32."""
    k1, k2, k3, k4 = jax.random.split(key, 4)
    bound1 = 1.0 / (in_size ** 0.5)
    bound2 = 1.0 / (h ** 0.5)
    w1 = jax.random.uniform(k1, (in_size, h), jnp.float32, -bound1, bound1)
    b1 = jax.random.uniform(k2, (1, h), jnp.float32, -bound1, bound1)
    w2 = jax.random.uniform(k3, (h, out_size), jnp.float32, -bound2, bound2)
    b2 = jax.random.uniform(k4, (1, out_size), jnp.float32, -bound2, bound2)
    return w1, b1, w2, b2


if __name__ == "__main__":
    # Small shapes consistent with the module: (N, in_size) -> (N, out_size)
    N, in_size, h, out_size = 8, 32, 128, 4

    key = jax.random.PRNGKey(0)
    kx, kp = jax.random.split(key)
    x = jax.random.normal(kx, (N, in_size), jnp.float32)
    w1, b1, w2, b2 = init_params(kp, in_size, h, out_size)

    # Pre-cast MXU weights to bf16 ONCE at parameter-prep time (halves weight
    # DMA bytes and removes the per-call pad/cast fusion).
    w1b = w1.astype(jnp.bfloat16)
    w2b = w2.astype(jnp.bfloat16)

    y = neuralnet_forward(x, w1b, b1, w2b, b2)
    jax.block_until_ready(y)
    assert y.shape == (N, out_size)

    # Reference 1: same math as the kernel (bf16 MXU operands, f32 accumulate).
    xb = x.astype(jnp.bfloat16).astype(jnp.float32)
    w1f = w1b.astype(jnp.float32)
    w2f = w2b.astype(jnp.float32)
    h_ref = jnp.maximum(xb @ w1f + b1, 0.0)
    y_bf16ref = h_ref.astype(jnp.bfloat16).astype(jnp.float32) @ w2f + b2
    assert jnp.allclose(y, y_bf16ref, atol=2e-3, rtol=2e-3)

    # Reference 2: pure-f32 PyTorch-equivalent forward (looser tol: bf16 MXU).
    y_f32ref = jnp.maximum(x @ w1 + b1, 0.0) @ w2 + b2
    assert jnp.allclose(y, y_f32ref, atol=3e-2, rtol=3e-2)

    # TODO(synk): step()/SGD training loop and loss_fn not implemented
    # (forward-only kernel).
    print("KERNEL_OK")
</pallas_src>

<mosaic_0001>
module attributes {stable_mosaic.version = 11 : i64} {
  func.func @_mlp_kernel(%arg0: i32, %arg1: memref<8x32xf32, #tpu.memory_space<vmem>>, %arg2: memref<32x128xbf16, #tpu.memory_space<vmem>>, %arg3: memref<1x128xf32, #tpu.memory_space<vmem>>, %arg4: memref<128x4xbf16, #tpu.memory_space<vmem>>, %arg5: memref<1x4xf32, #tpu.memory_space<vmem>>, %arg6: memref<8x4xf32, #tpu.memory_space<vmem>>) attributes {dimension_semantics = [#tpu.dimension_semantics<parallel>], iteration_bounds = array<i64: 1>, scalar_prefetch = 0 : i64, scratch_operands = 0 : i64, tpu.core_type = #tpu.core_type<tc>, window_params = [{transform_indices = @transform_0, window_bounds = array<i64: 8, 32>}, {pipeline_mode = #tpu.pipeline_mode<synchronous>, transform_indices = @transform_1, window_bounds = array<i64: 32, 128>}, {pipeline_mode = #tpu.pipeline_mode<synchronous>, transform_indices = @transform_2, window_bounds = array<i64: 1, 128>}, {pipeline_mode = #tpu.pipeline_mode<synchronous>, transform_indices = @transform_3, window_bounds = array<i64: 128, 4>}, {pipeline_mode = #tpu.pipeline_mode<synchronous>, transform_indices = @transform_4, window_bounds = array<i64: 1, 4>}, {transform_indices = @transform_5, window_bounds = array<i64: 8, 4>}]} {
    %c0 = arith.constant 0 : index
    %c0_0 = arith.constant 0 : index
    %0 = vector.load %arg1[%c0, %c0_0] : memref<8x32xf32, #tpu.memory_space<vmem>>, vector<8x32xf32>
    %1 = arith.truncf %0 : vector<8x32xf32> to vector<8x32xbf16>
    %c0_1 = arith.constant 0 : index
    %c0_2 = arith.constant 0 : index
    %2 = vector.load %arg2[%c0_1, %c0_2] : memref<32x128xbf16, #tpu.memory_space<vmem>>, vector<32x128xbf16>
    %cst = arith.constant dense<0.000000e+00> : vector<8x128xf32>
    %3 = tpu.matmul %1, %2, %cst {dimension_numbers = #tpu.dot_dimension_numbers<[1], [0], [0], [1], [0, 0, 1, 1], [], []>} : vector<8x32xbf16>, vector<32x128xbf16>, vector<8x128xf32> -> vector<8x128xf32>
    %c0_3 = arith.constant 0 : index
    %c0_4 = arith.constant 0 : index
    %4 = vector.load %arg3[%c0_3, %c0_4] : memref<1x128xf32, #tpu.memory_space<vmem>>, vector<1x128xf32>
    %5 = vector.broadcast %4 : vector<1x128xf32> to vector<8x128xf32>
    %6 = arith.addf %3, %5 : vector<8x128xf32>
    %cst_5 = arith.constant 0.000000e+00 : f32
    %7 = vector.broadcast %cst_5 : f32 to vector<8x128xf32>
    %8 = arith.maximumf %6, %7 : vector<8x128xf32>
    %c0_6 = arith.constant 0 : index
    %c0_7 = arith.constant 0 : index
    %9 = vector.load %arg4[%c0_6, %c0_7] : memref<128x4xbf16, #tpu.memory_space<vmem>>, vector<128x4xbf16>
    %10 = arith.truncf %8 : vector<8x128xf32> to vector<8x128xbf16>
    %cst_8 = arith.constant dense<0.000000e+00> : vector<8x4xf32>
    %11 = tpu.matmul %10, %9, %cst_8 {dimension_numbers = #tpu.dot_dimension_numbers<[1], [0], [0], [1], [0, 0, 1, 1], [], []>} : vector<8x128xbf16>, vector<128x4xbf16>, vector<8x4xf32> -> vector<8x4xf32>
    %c0_9 = arith.constant 0 : index
    %c0_10 = arith.constant 0 : index
    %12 = vector.load %arg5[%c0_9, %c0_10] : memref<1x4xf32, #tpu.memory_space<vmem>>, vector<1x4xf32>
    %13 = vector.broadcast %12 : vector<1x4xf32> to vector<8x4xf32>
    %14 = arith.addf %11, %13 : vector<8x4xf32>
    %c0_11 = arith.constant 0 : index
    %c0_12 = arith.constant 0 : index
    %15 = vector.load %arg6[%c0_11, %c0_12] : memref<8x4xf32, #tpu.memory_space<vmem>>, vector<8x4xf32>
    tpu.vector_store %arg6[%c0_11, %c0_12], %14 {strides = array<i32>} : memref<8x4xf32, #tpu.memory_space<vmem>>, vector<8x4xf32>,
    return
  }
  func.func @transform_0(%arg0: i32) -> (i32, i32) {
    %c0_i32 = arith.constant 0 : i32
    %c0_i32_0 = arith.constant 0 : i32
    return %arg0, %c0_i32 : i32, i32
  }
  func.func @transform_1(%arg0: i32) -> (i32, i32) {
    %c0_i32 = arith.constant 0 : i32
    %c0_i32_0 = arith.constant 0 : i32
    %c0_i32_1 = arith.constant 0 : i32
    return %c0_i32, %c0_i32_0 : i32, i32
  }
  func.func @transform_2(%arg0: i32) -> (i32, i32) {
    %c0_i32 = arith.constant 0 : i32
    %c0_i32_0 = arith.constant 0 : i32
    %c0_i32_1 = arith.constant 0 : i32
    return %c0_i32, %c0_i32_0 : i32, i32
  }
  func.func @transform_3(%arg0: i32) -> (i32, i32) {
    %c0_i32 = arith.constant 0 : i32
    %c0_i32_0 = arith.constant 0 : i32
    %c0_i32_1 = arith.constant 0 : i32
    return %c0_i32, %c0_i32_0 : i32, i32
  }
  func.func @transform_4(%arg0: i32) -> (i32, i32) {
    %c0_i32 = arith.constant 0 : i32
    %c0_i32_0 = arith.constant 0 : i32
    %c0_i32_1 = arith.constant 0 : i32
    return %c0_i32, %c0_i32_0 : i32, i32
  }
  func.func @transform_5(%arg0: i32) -> (i32, i32) {
    %c0_i32 = arith.constant 0 : i32
    %c0_i32_0 = arith.constant 0 : i32
    return %arg0, %c0_i32 : i32, i32
  }
}

</mosaic_0001>

<bundles_post_ra>
// kernel: neuralnet_forward.1
= control target key start
LH: loop header
LB: loop body
LE: loop exit
PB: predicated region body
PF: predicated region fallthrough
CT: control target
= control target key end

     0   :  { %v274_v0 = vmov 0.0   ;;  %vm275_vm0 = vmmov 0   ;;  %vm46_vm1 = vcmask 261120   ;;  %vm203_vm2 = vcmask 31744   ;;  %s348_s1 = inlined_call_operand.vmem [shape: bf16[32,128], index: 1, kind: input, shape index: {}]   ;;  %s349_s0 = inlined_call_operand.vmem [shape: f32[8,32], index: 0, kind: input, shape index: {}]   ;;  %s350_s3 = inlined_call_operand.vmem [shape: bf16[128,4], index: 3, kind: input, shape index: {}]   ;;  %s351_s2 = inlined_call_operand.vmem [shape: f32[1,128], index: 2, kind: input, shape index: {}]   ;;  %s352_s4 = inlined_call_operand.vmem [shape: f32[1,4], index: 4, kind: input, shape index: {}]   ;;  %s353_s5 = inlined_call_operand.vmem [shape: f32[8,4], index: 5, kind: output, shape index: {}]  }
   0x1   :  { %234 = vmatprep.subr.bf16.mxu0 %v274_v0  ;;  %v264_v1 = vld [vmem:[%s348_s1] sm:$0xff]   ;;  %238 = vmatprep.mubr.msk.bf16.mxu0 %vm275_vm0, %v274_v0  ;;  %v265_v2 = vld [vmem:[%s348_s1 + $0x8] sm:$0xff]   ;;  %v268_v7 = vld [vmem:[%s350_s3 + $0x10] sm:$0xff]  }
   0x2   :  { %242 = vmatprep.subr.bf16.mxu1 %v274_v0  ;;  %258 = vmatprep.mubr.msk.bf16.mxu1 %vm275_vm0, %v274_v0  ;;  %v21_v3 = vld [vmem:[%s349_s0] sm:$0xff]  ;;  %v267_v6 = vld [vmem:[%s350_s3 + $0x8] sm:$0xff]   ;;  %v269_v8 = vld [vmem:[%s350_s3 + $0x18] sm:$0xff]  }
   0x3   :  { %235 = vmatpush3.bf16.msra.mxu0 %v264_v1  ;;  %v266_v4 = vld [vmem:[%s350_s3] sm:$0xff]   ;;  %v22_v5 = vpack.c.bf16 %v21_v3, %v21_v3  ;;  %v271_v10 = vld [vmem:[%s350_s3 + $0x28] sm:$0xff]   ;;  %v272_v11 = vld [vmem:[%s350_s3 + $0x30] sm:$0xff]  }
   0x4   :  { %236 = vmatprep.subr.bf16.mxu0 %v274_v0  ;;  %243 = vmatpush3.bf16.msra.mxu1 %v266_v4  ;;  %v270_v9 = vld [vmem:[%s350_s3 + $0x20] sm:$0xff]   ;;  %v273_v12 = vld [vmem:[%s350_s3 + $0x38] sm:$0xff]  }
   0x5   :  { %244 = vmatprep.subr.bf16.mxu1 %v274_v0  ;;  %v209_v13 = vld [vmem:[%s351_s2] ss:$0 sm:$0xff] }
   0x6   :  { %v213_v21 = vld [vmem:[%s352_s4] ss:$0 sm:$0xff] }
   0x7   :  { %237 = vmatpush3.bf16.msra.mxu0 %v265_v2 }
   0x8   :  { %245 = vmatpush3.bf16.msra.mxu1 %v267_v6 }
   0x9   :  { %246 = vmatprep.subr.bf16.mxu1 %v274_v0 }
   0xa   :  { %239 = vmatmul.mubr.msk.bf16.vlgmr.msra.gmra.mrb[0].mxu0 %vm46_vm1, %v22_v5 }
   0xc   :  { %247 = vmatpush3.bf16.msra.mxu1 %v268_v7 }
   0xd   :  { %248 = vmatprep.subr.bf16.mxu1 %v274_v0 }
  0x10   :  { %249 = vmatpush3.bf16.msra.mxu1 %v269_v8 }
  0x11   :  { %250 = vmatprep.subr.bf16.mxu1 %v274_v0 }
  0x14   :  { %251 = vmatpush3.bf16.msra.mxu1 %v270_v9 }
  0x15   :  { %252 = vmatprep.subr.bf16.mxu1 %v274_v0 }
  0x18   :  { %253 = vmatpush3.bf16.msra.mxu1 %v271_v10 }
  0x19   :  { %254 = vmatprep.subr.bf16.mxu1 %v274_v0 }
  0x1c   :  { %255 = vmatpush3.bf16.msra.mxu1 %v272_v11 }
  0x1d   :  { %256 = vmatprep.subr.bf16.mxu1 %v274_v0 }
  0x20   :  { %257 = vmatpush3.bf16.msra.mxu1 %v273_v12 }
  0xdd   :  { %v84_v14 = vpop.f32.mrb[0].mxu0 }
  0xde   :  { %v85_v15 = vadd.f32 %v209_v13, %v84_v14  ;;  %v240_v16 = vpop.f32.mrb[1].mxu0 }
  0xdf   :  { %v87_v17 = vpop.f32.mrb[2].mxu0 }
  0xe0   :  { %v90_v18 = vmax.f32 %v85_v15, 0.0  ;;  %v241_v19 = vpop.f32.mrb[3].mxu0 }
  0xe2   :  { %v107_v20 = vpack.c.bf16 %v90_v18, %v90_v18 }
  0xe4   :  { %259 = vmatmul.mubr.bf16.vlgmr.msra.gmra.mrb[0].mxu1 %v107_v20 }
 0x1b7   :  { %v197_v22 = vpop.f32.mrb[0].mxu1 }
 0x1b8   :  { %v198_v23 = vadd.f32 %v213_v21, %v197_v22  ;;  %v260_v24 = vpop.f32.mrb[1].mxu1 }
 0x1b9   :  { %v200_v25 = vpop.f32.mrb[2].mxu1 }
 0x1ba   :  { %204 = vst.msk [vmem:[%s353_s5] sm:$0xff] %vm203_vm2, %v198_v23  ;;  %v261_v26 = vpop.f32.mrb[3].mxu1 }

</bundles_post_ra>
